<compile_context>
chip_gen: v5e
topology: v5e:2x2
jax: 0.10.0
libtpu: 0.0.40
codegen_flags: <defaults>
</compile_context>

<pallas_src>
import functools

import jax
import jax.numpy as jnp
from jax import lax
from jax.experimental import pallas as pl
from jax.experimental.pallas import tpu as pltpu

H, W = 7, 2            # spatial size fixed by fc1 = Linear(32*7*2, hidden)


def _round_up(x, m):
    return (x + m - 1) // m * m


# -----------------------------------------------------------------------------
# Pallas kernel: fused conv1+relu -> conv2+relu -> fc1+relu -> fc2.
# Every layer is a VMEM-resident matmul on the MXU; activations never leave
# VMEM, biases are loaded once as (1, N) rows and broadcast.
# -----------------------------------------------------------------------------
def _fused_forward_kernel(x_ref, w1_ref, b1_ref, w2_ref, b2_ref,
                          w3_ref, b3_ref, w4_ref, b4_ref, o_ref):
    a = jnp.dot(x_ref[...], w1_ref[...], preferred_element_type=jnp.float32)
    a = jnp.maximum(a + b1_ref[...], 0.0)                      # conv1 + relu
    a = jnp.dot(a, w2_ref[...], preferred_element_type=jnp.float32)
    a = jnp.maximum(a + b2_ref[...], 0.0)                      # conv2 + relu
    a = jnp.dot(a, w3_ref[...], preferred_element_type=jnp.float32)
    a = jnp.maximum(a + b3_ref[...], 0.0)                      # fc1 + relu
    a = jnp.dot(a, w4_ref[...], preferred_element_type=jnp.float32)
    o_ref[...] = a + b4_ref[...]                               # fc2


def conv_network_forward(packed, x, *, out_dim):
    """Forward pass. `packed` is the pre-padded parameter pack from pack_params."""
    w1p, b1p, w2p, b2p, w3p, b3p, w4p, b4p = packed
    B = x.shape[0]
    k1p = w1p.shape[0]
    noutp = w4p.shape[1]
    mp = _round_up(max(B, 8), 8)

    # NCHW flatten == (c, h, w) feature order -- exactly torch x.reshape(B,-1).
    xf = x.reshape(B, -1)
    xp = jnp.zeros((mp, k1p), jnp.float32).at[:B, :xf.shape[1]].set(xf)

    operands = (xp,) + tuple(packed)
    # TODO(synk): for large RL rollout batches, add an M-tiled "parallel" grid
    # axis (2 TCs on v7x) and store weights in bf16 for the v6e/v7x MXU.
    out = pl.pallas_call(
        _fused_forward_kernel,
        out_shape=jax.ShapeDtypeStruct((mp, noutp), jnp.float32),
        grid=(1,),
        in_specs=[pl.BlockSpec(op.shape, lambda i: (0, 0)) for op in operands],
        out_specs=pl.BlockSpec((mp, noutp), lambda i: (0, 0)),
        compiler_params=pltpu.CompilerParams(
            dimension_semantics=("arbitrary",)),
    )(*operands)
    return out[:B, :out_dim]


# -----------------------------------------------------------------------------
# One-time parameter packing (outside the jitted forward).
# -----------------------------------------------------------------------------
def _pad2(a, rows, cols):
    a = jnp.asarray(a, jnp.float32)
    return jnp.zeros((rows, cols), jnp.float32).at[:a.shape[0], :a.shape[1]].set(a)


def _conv_as_matrix(w):
    """Dense (C_in*H*W, C_out*H*W) matrix of a 3x3 / stride 1 / pad 1 conv,
    with NCHW per-sample flatten order on both input and output sides."""
    c_out, c_in, _, _ = w.shape
    k = c_in * H * W
    basis = jnp.eye(k, dtype=jnp.float32).reshape(k, c_in, H, W)
    y = lax.conv_general_dilated(
        basis, w.astype(jnp.float32), window_strides=(1, 1),
        padding=((1, 1), (1, 1)),
        dimension_numbers=("NCHW", "OIHW", "NCHW"))
    return y.reshape(k, c_out * H * W)


def pack_params(params):
    """Fold convs into dense matrices, transpose fc weights, broadcast conv
    biases to NCHW-flat order, and pad everything to (8,128)-aligned slabs."""
    w1, b1, w2, b2, wfc1, bfc1, wfc2, bfc2 = params

    big_w1 = _conv_as_matrix(w1)                    # (C_in*HW, 16*HW)
    big_b1 = jnp.repeat(b1, H * W)[None, :]         # c-major, matches flatten
    big_w2 = _conv_as_matrix(w2)                    # (16*HW, 32*HW)
    big_b2 = jnp.repeat(b2, H * W)[None, :]

    k1p = _round_up(big_w1.shape[0], 128)           # 56  -> 128
    n1p = _round_up(big_w1.shape[1], 128)           # 224 -> 256
    n2p = _round_up(big_w2.shape[1], 128)           # 448 -> 512
    n3p = _round_up(wfc1.shape[0], 128)             # hidden -> 128
    n4p = _round_up(wfc2.shape[0], 128)             # out    -> 128

    return (
        _pad2(big_w1, k1p, n1p), _pad2(big_b1, 1, n1p),
        _pad2(big_w2, n1p, n2p), _pad2(big_b2, 1, n2p),
        _pad2(wfc1.T, n2p, n3p), _pad2(bfc1[None, :], 1, n3p),
        _pad2(wfc2.T, n3p, n4p), _pad2(bfc2[None, :], 1, n4p),
    )


# -----------------------------------------------------------------------------
# Deterministic parameter init (PyTorch-style uniform(-1/sqrt(fan_in), ...))
# -----------------------------------------------------------------------------
def init_params(key, input_channels, hidden_size, output_size):
    ks = jax.random.split(key, 8)

    def u(k, shape, fan_in):
        bound = 1.0 / float(fan_in) ** 0.5
        return jax.random.uniform(k, shape, jnp.float32, -bound, bound)

    w1 = u(ks[0], (16, input_channels, 3, 3), input_channels * 9)
    b1 = u(ks[1], (16,), input_channels * 9)
    w2 = u(ks[2], (32, 16, 3, 3), 16 * 9)
    b2 = u(ks[3], (32,), 16 * 9)
    wfc1 = u(ks[4], (hidden_size, 32 * H * W), 32 * H * W)
    bfc1 = u(ks[5], (hidden_size,), 32 * H * W)
    wfc2 = u(ks[6], (output_size, hidden_size), hidden_size)
    bfc2 = u(ks[7], (output_size,), hidden_size)
    return (w1, b1, w2, b2, wfc1, bfc1, wfc2, bfc2)


# -----------------------------------------------------------------------------
# Pure-JAX reference (for correctness check only)
# -----------------------------------------------------------------------------
def reference_forward(params, x):
    w1, b1, w2, b2, wfc1, bfc1, wfc2, bfc2 = params

    def conv_relu(inp, w, b):
        y = lax.conv_general_dilated(
            inp, w, window_strides=(1, 1), padding=((1, 1), (1, 1)),
            dimension_numbers=("NCHW", "OIHW", "NCHW"))
        return jax.nn.relu(y + b[None, :, None, None])

    y = conv_relu(x, w1, b1)
    y = conv_relu(y, w2, b2)
    f = y.reshape(y.shape[0], -1)
    h = jax.nn.relu(f @ wfc1.T + bfc1)
    return h @ wfc2.T + bfc2


if __name__ == "__main__":
    key = jax.random.PRNGKey(0)
    k_param, k_x = jax.random.split(key)

    B, C_IN = 2, 4
    HIDDEN, OUT = 32, 4

    params = init_params(k_param, C_IN, HIDDEN, OUT)
    packed = pack_params(params)                       # one-time prep
    x = jax.random.normal(k_x, (B, C_IN, H, W), jnp.float32)

    fwd = jax.jit(functools.partial(conv_network_forward, out_dim=OUT))
    out = jax.block_until_ready(fwd(packed, x))

    ref = reference_forward(params, x)
    assert out.shape == (B, OUT), out.shape
    # all-f32 path: 10x tighter tolerance than the previous 2e-2 check.
    if not jnp.allclose(out, ref, atol=2e-3, rtol=2e-3):
        raise AssertionError(
            f"mismatch vs reference: max abs diff {jnp.max(jnp.abs(out - ref))}")

    print("KERNEL_OK")
</pallas_src>

<mosaic_0001>
module attributes {stable_mosaic.version = 11 : i64} {
  func.func @_fused_forward_kernel(%arg0: i32, %arg1: memref<8x128xf32, #tpu.memory_space<vmem>>, %arg2: memref<128x256xf32, #tpu.memory_space<vmem>>, %arg3: memref<1x256xf32, #tpu.memory_space<vmem>>, %arg4: memref<256x512xf32, #tpu.memory_space<vmem>>, %arg5: memref<1x512xf32, #tpu.memory_space<vmem>>, %arg6: memref<512x128xf32, #tpu.memory_space<vmem>>, %arg7: memref<1x128xf32, #tpu.memory_space<vmem>>, %arg8: memref<128x128xf32, #tpu.memory_space<vmem>>, %arg9: memref<1x128xf32, #tpu.memory_space<vmem>>, %arg10: memref<8x128xf32, #tpu.memory_space<vmem>>) attributes {dimension_semantics = [#tpu.dimension_semantics<arbitrary>], iteration_bounds = array<i64: 1>, scalar_prefetch = 0 : i64, scratch_operands = 0 : i64, tpu.core_type = #tpu.core_type<tc>, window_params = [{pipeline_mode = #tpu.pipeline_mode<synchronous>, transform_indices = @transform_0, window_bounds = array<i64: 8, 128>}, {pipeline_mode = #tpu.pipeline_mode<synchronous>, transform_indices = @transform_1, window_bounds = array<i64: 128, 256>}, {pipeline_mode = #tpu.pipeline_mode<synchronous>, transform_indices = @transform_2, window_bounds = array<i64: 1, 256>}, {pipeline_mode = #tpu.pipeline_mode<synchronous>, transform_indices = @transform_3, window_bounds = array<i64: 256, 512>}, {pipeline_mode = #tpu.pipeline_mode<synchronous>, transform_indices = @transform_4, window_bounds = array<i64: 1, 512>}, {pipeline_mode = #tpu.pipeline_mode<synchronous>, transform_indices = @transform_5, window_bounds = array<i64: 512, 128>}, {pipeline_mode = #tpu.pipeline_mode<synchronous>, transform_indices = @transform_6, window_bounds = array<i64: 1, 128>}, {pipeline_mode = #tpu.pipeline_mode<synchronous>, transform_indices = @transform_7, window_bounds = array<i64: 128, 128>}, {pipeline_mode = #tpu.pipeline_mode<synchronous>, transform_indices = @transform_8, window_bounds = array<i64: 1, 128>}, {pipeline_mode = #tpu.pipeline_mode<synchronous>, transform_indices = @transform_9, window_bounds = array<i64: 8, 128>}]} {
    %c0 = arith.constant 0 : index
    %c0_0 = arith.constant 0 : index
    %0 = vector.load %arg1[%c0, %c0_0] : memref<8x128xf32, #tpu.memory_space<vmem>>, vector<8x128xf32>
    %c0_1 = arith.constant 0 : index
    %c0_2 = arith.constant 0 : index
    %1 = vector.load %arg2[%c0_1, %c0_2] : memref<128x256xf32, #tpu.memory_space<vmem>>, vector<128x256xf32>
    %cst = arith.constant dense<0.000000e+00> : vector<8x256xf32>
    %2 = tpu.matmul %0, %1, %cst {dimension_numbers = #tpu.dot_dimension_numbers<[1], [0], [0], [1], [0, 0, 1, 1], [], []>} : vector<8x128xf32>, vector<128x256xf32>, vector<8x256xf32> -> vector<8x256xf32>
    %c0_3 = arith.constant 0 : index
    %c0_4 = arith.constant 0 : index
    %3 = vector.load %arg3[%c0_3, %c0_4] : memref<1x256xf32, #tpu.memory_space<vmem>>, vector<1x256xf32>
    %4 = vector.broadcast %3 : vector<1x256xf32> to vector<8x256xf32>
    %5 = arith.addf %2, %4 : vector<8x256xf32>
    %cst_5 = arith.constant 0.000000e+00 : f32
    %6 = vector.broadcast %cst_5 : f32 to vector<8x256xf32>
    %7 = arith.maximumf %5, %6 : vector<8x256xf32>
    %c0_6 = arith.constant 0 : index
    %c0_7 = arith.constant 0 : index
    %8 = vector.load %arg4[%c0_6, %c0_7] : memref<256x512xf32, #tpu.memory_space<vmem>>, vector<256x512xf32>
    %cst_8 = arith.constant dense<0.000000e+00> : vector<8x512xf32>
    %9 = tpu.matmul %7, %8, %cst_8 {dimension_numbers = #tpu.dot_dimension_numbers<[1], [0], [0], [1], [0, 0, 1, 1], [], []>} : vector<8x256xf32>, vector<256x512xf32>, vector<8x512xf32> -> vector<8x512xf32>
    %c0_9 = arith.constant 0 : index
    %c0_10 = arith.constant 0 : index
    %10 = vector.load %arg5[%c0_9, %c0_10] : memref<1x512xf32, #tpu.memory_space<vmem>>, vector<1x512xf32>
    %11 = vector.broadcast %10 : vector<1x512xf32> to vector<8x512xf32>
    %12 = arith.addf %9, %11 : vector<8x512xf32>
    %cst_11 = arith.constant 0.000000e+00 : f32
    %13 = vector.broadcast %cst_11 : f32 to vector<8x512xf32>
    %14 = arith.maximumf %12, %13 : vector<8x512xf32>
    %c0_12 = arith.constant 0 : index
    %c0_13 = arith.constant 0 : index
    %15 = vector.load %arg6[%c0_12, %c0_13] : memref<512x128xf32, #tpu.memory_space<vmem>>, vector<512x128xf32>
    %cst_14 = arith.constant dense<0.000000e+00> : vector<8x128xf32>
    %16 = tpu.matmul %14, %15, %cst_14 {dimension_numbers = #tpu.dot_dimension_numbers<[1], [0], [0], [1], [0, 0, 1, 1], [], []>} : vector<8x512xf32>, vector<512x128xf32>, vector<8x128xf32> -> vector<8x128xf32>
    %c0_15 = arith.constant 0 : index
    %c0_16 = arith.constant 0 : index
    %17 = vector.load %arg7[%c0_15, %c0_16] : memref<1x128xf32, #tpu.memory_space<vmem>>, vector<1x128xf32>
    %18 = vector.broadcast %17 : vector<1x128xf32> to vector<8x128xf32>
    %19 = arith.addf %16, %18 : vector<8x128xf32>
    %cst_17 = arith.constant 0.000000e+00 : f32
    %20 = vector.broadcast %cst_17 : f32 to vector<8x128xf32>
    %21 = arith.maximumf %19, %20 : vector<8x128xf32>
    %c0_18 = arith.constant 0 : index
    %c0_19 = arith.constant 0 : index
    %22 = vector.load %arg8[%c0_18, %c0_19] : memref<128x128xf32, #tpu.memory_space<vmem>>, vector<128x128xf32>
    %cst_20 = arith.constant dense<0.000000e+00> : vector<8x128xf32>
    %23 = tpu.matmul %21, %22, %cst_20 {dimension_numbers = #tpu.dot_dimension_numbers<[1], [0], [0], [1], [0, 0, 1, 1], [], []>} : vector<8x128xf32>, vector<128x128xf32>, vector<8x128xf32> -> vector<8x128xf32>
    %c0_21 = arith.constant 0 : index
    %c0_22 = arith.constant 0 : index
    %24 = vector.load %arg9[%c0_21, %c0_22] : memref<1x128xf32, #tpu.memory_space<vmem>>, vector<1x128xf32>
    %25 = vector.broadcast %24 : vector<1x128xf32> to vector<8x128xf32>
    %26 = arith.addf %23, %25 : vector<8x128xf32>
    %c0_23 = arith.constant 0 : index
    %c0_24 = arith.constant 0 : index
    %27 = vector.load %arg10[%c0_23, %c0_24] : memref<8x128xf32, #tpu.memory_space<vmem>>, vector<8x128xf32>
    tpu.vector_store %arg10[%c0_23, %c0_24], %26 {strides = array<i32>} : memref<8x128xf32, #tpu.memory_space<vmem>>, vector<8x128xf32>,
    return
  }
  func.func @transform_0(%arg0: i32) -> (i32, i32) {
    %c0_i32 = arith.constant 0 : i32
    %c0_i32_0 = arith.constant 0 : i32
    %c0_i32_1 = arith.constant 0 : i32
    return %c0_i32, %c0_i32_0 : i32, i32
  }
  func.func @transform_1(%arg0: i32) -> (i32, i32) {
    %c0_i32 = arith.constant 0 : i32
    %c0_i32_0 = arith.constant 0 : i32
    %c0_i32_1 = arith.constant 0 : i32
    return %c0_i32, %c0_i32_0 : i32, i32
  }
  func.func @transform_2(%arg0: i32) -> (i32, i32) {
    %c0_i32 = arith.constant 0 : i32
    %c0_i32_0 = arith.constant 0 : i32
    %c0_i32_1 = arith.constant 0 : i32
    return %c0_i32, %c0_i32_0 : i32, i32
  }
  func.func @transform_3(%arg0: i32) -> (i32, i32) {
    %c0_i32 = arith.constant 0 : i32
    %c0_i32_0 = arith.constant 0 : i32
    %c0_i32_1 = arith.constant 0 : i32
    return %c0_i32, %c0_i32_0 : i32, i32
  }
  func.func @transform_4(%arg0: i32) -> (i32, i32) {
    %c0_i32 = arith.constant 0 : i32
    %c0_i32_0 = arith.constant 0 : i32
    %c0_i32_1 = arith.constant 0 : i32
    return %c0_i32, %c0_i32_0 : i32, i32
  }
  func.func @transform_5(%arg0: i32) -> (i32, i32) {
    %c0_i32 = arith.constant 0 : i32
    %c0_i32_0 = arith.constant 0 : i32
    %c0_i32_1 = arith.constant 0 : i32
    return %c0_i32, %c0_i32_0 : i32, i32
  }
  func.func @transform_6(%arg0: i32) -> (i32, i32) {
    %c0_i32 = arith.constant 0 : i32
    %c0_i32_0 = arith.constant 0 : i32
    %c0_i32_1 = arith.constant 0 : i32
    return %c0_i32, %c0_i32_0 : i32, i32
  }
  func.func @transform_7(%arg0: i32) -> (i32, i32) {
    %c0_i32 = arith.constant 0 : i32
    %c0_i32_0 = arith.constant 0 : i32
    %c0_i32_1 = arith.constant 0 : i32
    return %c0_i32, %c0_i32_0 : i32, i32
  }
  func.func @transform_8(%arg0: i32) -> (i32, i32) {
    %c0_i32 = arith.constant 0 : i32
    %c0_i32_0 = arith.constant 0 : i32
    %c0_i32_1 = arith.constant 0 : i32
    return %c0_i32, %c0_i32_0 : i32, i32
  }
  func.func @transform_9(%arg0: i32) -> (i32, i32) {
    %c0_i32 = arith.constant 0 : i32
    %c0_i32_0 = arith.constant 0 : i32
    %c0_i32_1 = arith.constant 0 : i32
    return %c0_i32, %c0_i32_0 : i32, i32
  }
}

</mosaic_0001>

<bundles_post_ra>
// kernel: conv_network_forward.1
= control target key start
LH: loop header
LB: loop body
LE: loop exit
PB: predicated region body
PF: predicated region fallthrough
CT: control target
= control target key end

     0   :  { %14 = vsyncpa [#allocation3], 0  ;;  %s879_s0 = inlined_call_operand.vmem [shape: f32[8,128], index: 0, kind: input, shape index: {}]   ;;  %s880_s1 = inlined_call_operand.hbm [shape: f32[128,256], index: 1, kind: input, shape index: {}]   ;;  %s881_s2 = inlined_call_operand.vmem [shape: f32[1,256], index: 2, kind: input, shape index: {}]   ;;  %s882_s3 = inlined_call_operand.hbm [shape: f32[256,512], index: 3, kind: input, shape index: {}]   ;;  %s883_s4 = inlined_call_operand.vmem [shape: f32[1,512], index: 4, kind: input, shape index: {}]   ;;  %s884_s5 = inlined_call_operand.hbm [shape: f32[512,128], index: 5, kind: input, shape index: {}]   ;;  %s885_s6 = inlined_call_operand.vmem [shape: f32[1,128], index: 6, kind: input, shape index: {}]   ;;  %s886_s7 = inlined_call_operand.vmem [shape: f32[128,128], index: 7, kind: input, shape index: {}]   ;;  %s887_s8 = inlined_call_operand.vmem [shape: f32[1,128], index: 8, kind: input, shape index: {}]   ;;  %s888_s9 = inlined_call_operand.vmem [shape: f32[8,128], index: 9, kind: output, shape index: {}]  }
   0x1   :  { %15 = vsyncpa [#allocation5], 0  ;;  %s37_s11 = sshll.u32 %s882_s3, 4  ;;  %s745_s12 = smov [#allocation4]   ;;  %s38_s11 = int_to_ptr.hbm [resolvable:$true] %s37_s11 }
   0x2   :  { %s39_s13 = sshll.u32 %s745_s12, 4  ;;  %s22_s16 = sshll.u32 %s880_s1, 4  ;;  %s40_s13 = int_to_ptr.vmem [resolvable:$true] %s39_s13  ;;  %s23_s16 = int_to_ptr.hbm [resolvable:$true] %s22_s16 }
   0x3   :  { %s746_s17 = smov 512   ;;  %s747_s18 = smov 32  }
   0x4   :  { %45 = dma.hbm_to_vmem [thread:$0]  %s38_s11, 16384, %s40_s13, [#allocation5], %s746_s17, %s746_s17, %s747_s18  }
   0x5   :  { %s748_s19 = smov [#allocation2]   ;;  %s749_s21 = smov 256  }
   0x6   :  { %s24_s20 = sshll.u32 %s748_s19, 4  ;;  %s750_s22 = smov 16   ;;  %s25_s20 = int_to_ptr.vmem [resolvable:$true] %s24_s20 }
   0x7   :  { %30 = dma.hbm_to_vmem [thread:$0]  %s23_s16, 4096, %s25_s20, [#allocation3], %s749_s21, %s749_s21, %s750_s22  }
   0x8   :  { %s52_s24 = sshll.u32 %s884_s5, 4  ;;  %s751_s25 = smov [#allocation6]   ;;  %s53_s24 = int_to_ptr.hbm [resolvable:$true] %s52_s24 }
   0x9   :  { %s54_s26 = sshll.u32 %s751_s25, 4  ;;  %s752_s27 = smov 128   ;;  %s55_s26 = int_to_ptr.vmem [resolvable:$true] %s54_s26 }
   0xa   :  { %s753_s1 = smov 8  }
   0xb   :  { %60 = dma.hbm_to_vmem [thread:$0]  %s53_s24, 8192, %s55_s26, [#allocation5], %s752_s27, %s752_s27, %s753_s1  }
   0xc   :  { %741 = dma.done.wait [#allocation3], 4096  }
   0xd   :  { %742 = vsyncadd [#allocation3], 4294963200 }
   0xe   :  { %743 = dma.done.wait [#allocation5], 24576  }
   0xf   :  { %744 = vsyncadd [#allocation5], 4294942720  ;;  %v110_v0 = vld [vmem:[#allocation2 + $0xf0] sm:$0xff]  ;;  %v111_v1 = vld [vmem:[#allocation2 + $0xf8] sm:$0xff] }
  0x10   :  { %v108_v2 = vld [vmem:[#allocation2 + $0xe0] sm:$0xff]  ;;  %118 = vmatpush.msra.mxu0 %v110_v0  ;;  %138 = vmatpush.msra.mxu1 %v111_v1  ;;  %v109_v3 = vld [vmem:[#allocation2 + $0xe8] sm:$0xff]  ;;  %v106_v4 = vld [vmem:[#allocation2 + $0xd0] sm:$0xff] }
  0x11   :  { %v107_v5 = vld [vmem:[#allocation2 + $0xd8] sm:$0xff]  ;;  %v104_v6 = vld [vmem:[#allocation2 + $0xc0] sm:$0xff]  ;;  %v105_v7 = vld [vmem:[#allocation2 + $0xc8] sm:$0xff] }
  0x12   :  { %119 = vmatpush.msra.mxu0 %v108_v2  ;;  %139 = vmatpush.msra.mxu1 %v109_v3  ;;  %v102_v8 = vld [vmem:[#allocation2 + $0xb0] sm:$0xff]  ;;  %v103_v9 = vld [vmem:[#allocation2 + $0xb8] sm:$0xff]  ;;  %v100_v10 = vld [vmem:[#allocation2 + $0xa0] sm:$0xff] }
  0x13   :  { %v101_v11 = vld [vmem:[#allocation2 + $0xa8] sm:$0xff]  ;;  %v98_v12 = vld [vmem:[#allocation2 + $0x90] sm:$0xff]  ;;  %v99_v13 = vld [vmem:[#allocation2 + $0x98] sm:$0xff] }
  0x14   :  { %120 = vmatpush.msra.mxu0 %v106_v4  ;;  %140 = vmatpush.msra.mxu1 %v107_v5  ;;  %v96_v14 = vld [vmem:[#allocation2 + $0x80] sm:$0xff]  ;;  %v97_v17 = vld [vmem:[#allocation2 + $0x88] sm:$0xff]  ;;  %v94_v21 = vld [vmem:[#allocation2 + $0x70] sm:$0xff] }
  0x15   :  { %v220_v15 = vld [vmem:[#allocation4 + $0x1e0] sm:$0xff]  ;;  %v95_v22 = vld [vmem:[#allocation2 + $0x78] sm:$0xff]  ;;  %v93_v27 = vld [vmem:[#allocation2 + $0x68] sm:$0xff] }
  0x16   :  { %121 = vmatpush.msra.mxu0 %v104_v6  ;;  %141 = vmatpush.msra.mxu1 %v105_v7  ;;  %v284_v16 = vld [vmem:[#allocation4 + $0x3e0] sm:$0xff]  ;;  %v90_v30 = vld [vmem:[#allocation2 + $0x50] sm:$0xff]  ;;  %v91_v31 = vld [vmem:[#allocation2 + $0x58] sm:$0xff] }
  0x17   :  { %298 = vmatpush.msra.mxu2 %v220_v15  ;;  %318 = vmatpush.msra.mxu3 %v284_v16  ;;  %v216_v18 = vld [vmem:[#allocation4 + $0x1c0] sm:$0xff]  ;;  %v89_v35 = vld [vmem:[#allocation2 + $0x48] sm:$0xff]  ;;  %v86_v38 = vld [vmem:[#allocation2 + $0x30] sm:$0xff] }
  0x18   :  { %122 = vmatpush.msra.mxu0 %v102_v8  ;;  %142 = vmatpush.msra.mxu1 %v103_v9  ;;  %v280_v19 = vld [vmem:[#allocation4 + $0x3c0] sm:$0xff]  ;;  %v87_v39 = vld [vmem:[#allocation2 + $0x38] sm:$0xff]  ;;  %v85_v43 = vld [vmem:[#allocation2 + $0x28] sm:$0xff] }
  0x19   :  { %v212_v20 = vld [vmem:[#allocation4 + $0x1a0] sm:$0xff]  ;;  %299 = vmatpush.msra.mxu2 %v216_v18  ;;  %319 = vmatpush.msra.mxu3 %v280_v19  ;;  %v82_v46 = vld [vmem:[#allocation2 + $0x10] sm:$0xff]  ;;  %v83_v47 = vld [vmem:[#allocation2 + $0x18] sm:$0xff] }
  0x1a   :  { %123 = vmatpush.msra.mxu0 %v100_v10  ;;  %143 = vmatpush.msra.mxu1 %v101_v11  ;;  %v276_v23 = vld [vmem:[#allocation4 + $0x3a0] sm:$0xff]  ;;  %v81_v51 = vld [vmem:[#allocation2 + $0x8] sm:$0xff]  ;;  %v222_v15 = vld [vmem:[#allocation4 + $0x1f0] sm:$0xff] }
  0x1b   :  { %v208_v24 = vld [vmem:[#allocation4 + $0x180] sm:$0xff]  ;;  %300 = vmatpush.msra.mxu2 %v212_v20  ;;  %320 = vmatpush.msra.mxu3 %v276_v23  ;;  %v221_v53 = vld [vmem:[#allocation4 + $0x1e8] sm:$0xff]  ;;  %v286_v16 = vld [vmem:[#allocation4 + $0x3f0] sm:$0xff] }
  0x1c   :  { %124 = vmatpush.msra.mxu0 %v98_v12  ;;  %144 = vmatpush.msra.mxu1 %v99_v13  ;;  %v272_v25 = vld [vmem:[#allocation4 + $0x380] sm:$0xff]  ;;  %v285_v54 = vld [vmem:[#allocation4 + $0x3e8] sm:$0xff]  ;;  %v218_v19 = vld [vmem:[#allocation4 + $0x1d0] sm:$0xff] }
  0x1d   :  { %v92_v26 = vld [vmem:[#allocation2 + $0x60] sm:$0xff]  ;;  %301 = vmatpush.msra.mxu2 %v208_v24  ;;  %321 = vmatpush.msra.mxu3 %v272_v25  ;;  %v217_v57 = vld [vmem:[#allocation4 + $0x1c8] sm:$0xff]  ;;  %v282_v20 = vld [vmem:[#allocation4 + $0x3d0] sm:$0xff] }
  0x1e   :  { %125 = vmatpush.msra.mxu0 %v96_v14  ;;  %145 = vmatpush.msra.mxu1 %v97_v17  ;;  %v204_v28 = vld [vmem:[#allocation4 + $0x160] sm:$0xff]  ;;  %v281_v58 = vld [vmem:[#allocation4 + $0x3c8] sm:$0xff]  ;;  %v214_v23 = vld [vmem:[#allocation4 + $0x1b0] sm:$0xff] }
  0x1f   :  { %v268_v29 = vld [vmem:[#allocation4 + $0x360] sm:$0xff]  ;;  %302 = vmatpush.msra.mxu2 %v204_v28  ;;  %v213_v61 = vld [vmem:[#allocation4 + $0x1a8] sm:$0xff]  ;;  %v278_v24 = vld [vmem:[#allocation4 + $0x3b0] sm:$0xff] }
  0x20   :  { %126 = vmatpush.msra.mxu0 %v94_v21  ;;  %146 = vmatpush.msra.mxu1 %v95_v22  ;;  %v200_v32 = vld [vmem:[#allocation4 + $0x140] sm:$0xff]  ;;  %v277_v62 = vld [vmem:[#allocation4 + $0x3a8] sm:$0xff]  ;;  %v274_v28 = vld [vmem:[#allocation4 + $0x390] sm:$0xff] }
  0x21   :  { %v264_v33 = vld [vmem:[#allocation4 + $0x340] sm:$0xff]  ;;  %322 = vmatpush.msra.mxu3 %v268_v29  ;;  %303 = vmatpush.msra.mxu2 %v200_v32  ;;  %v209_v1 = vld [vmem:[#allocation4 + $0x188] sm:$0xff]  ;;  %v270_v32 = vld [vmem:[#allocation4 + $0x370] sm:$0xff] }
  0x22   :  { %127 = vmatpush.msra.mxu0 %v92_v26  ;;  %147 = vmatpush.msra.mxu1 %v93_v27  ;;  %v88_v34 = vld [vmem:[#allocation2 + $0x40] sm:$0xff]  ;;  %v273_v2 = vld [vmem:[#allocation4 + $0x388] sm:$0xff]  ;;  %v210_v27 = vld [vmem:[#allocation4 + $0x190] sm:$0xff] }
  0x23   :  { %v196_v36 = vld [vmem:[#allocation4 + $0x120] sm:$0xff]  ;;  %323 = vmatpush.msra.mxu3 %v264_v33  ;;  %v205_v5 = vld [vmem:[#allocation4 + $0x168] sm:$0xff] }
  0x24   :  { %128 = vmatpush.msra.mxu0 %v90_v30  ;;  %148 = vmatpush.msra.mxu1 %v91_v31  ;;  %v260_v37 = vld [vmem:[#allocation4 + $0x320] sm:$0xff]  ;;  %v269_v6 = vld [vmem:[#allocation4 + $0x368] sm:$0xff]  ;;  %v206_v31 = vld [vmem:[#allocation4 + $0x170] sm:$0xff] }
  0x25   :  { %v192_v40 = vld [vmem:[#allocation4 + $0x100] sm:$0xff]  ;;  %304 = vmatpush.msra.mxu2 %v196_v36  ;;  %324 = vmatpush.msra.mxu3 %v260_v37  ;;  %v201_v9 = vld [vmem:[#allocation4 + $0x148] sm:$0xff]  ;;  %v266_v36 = vld [vmem:[#allocation4 + $0x350] sm:$0xff] }
  0x26   :  { %129 = vmatpush.msra.mxu0 %v88_v34  ;;  %149 = vmatpush.msra.mxu1 %v89_v35  ;;  %v256_v41 = vld [vmem:[#allocation4 + $0x300] sm:$0xff]  ;;  %v265_v10 = vld [vmem:[#allocation4 + $0x348] sm:$0xff]  ;;  %v202_v35 = vld [vmem:[#allocation4 + $0x150] sm:$0xff] }
  0x27   :  { %v84_v42 = vld [vmem:[#allocation2 + $0x20] sm:$0xff]  ;;  %305 = vmatpush.msra.mxu2 %v192_v40  ;;  %325 = vmatpush.msra.mxu3 %v256_v41  ;;  %v197_v13 = vld [vmem:[#allocation4 + $0x128] sm:$0xff]  ;;  %v262_v40 = vld [vmem:[#allocation4 + $0x330] sm:$0xff] }
  0x28   :  { %130 = vmatpush.msra.mxu0 %v86_v38  ;;  %150 = vmatpush.msra.mxu1 %v87_v39  ;;  %v188_v44 = vld [vmem:[#allocation4 + $0xe0] sm:$0xff]  ;;  %v261_v14 = vld [vmem:[#allocation4 + $0x328] sm:$0xff]  ;;  %v198_v39 = vld [vmem:[#allocation4 + $0x130] sm:$0xff] }
  0x29   :  { %v252_v45 = vld [vmem:[#allocation4 + $0x2e0] sm:$0xff]  ;;  %306 = vmatpush.msra.mxu2 %v188_v44  ;;  %v193_v17 = vld [vmem:[#allocation4 + $0x108] sm:$0xff]  ;;  %v258_v44 = vld [vmem:[#allocation4 + $0x310] sm:$0xff] }
  0x2a   :  { %131 = vmatpush.msra.mxu0 %v84_v42  ;;  %151 = vmatpush.msra.mxu1 %v85_v43  ;;  %v184_v48 = vld [vmem:[#allocation4 + $0xc0] sm:$0xff]  ;;  %v257_v18 = vld [vmem:[#allocation4 + $0x308] sm:$0xff]  ;;  %v194_v43 = vld [vmem:[#allocation4 + $0x110] sm:$0xff] }
  0x2b   :  { %v248_v49 = vld [vmem:[#allocation4 + $0x2c0] sm:$0xff]  ;;  %326 = vmatpush.msra.mxu3 %v252_v45  ;;  %307 = vmatpush.msra.mxu2 %v184_v48  ;;  %v189_v21 = vld [vmem:[#allocation4 + $0xe8] sm:$0xff]  ;;  %v254_v48 = vld [vmem:[#allocation4 + $0x2f0] sm:$0xff] }
  0x2c   :  { %v80_v50 = vld [vmem:[#allocation2] sm:$0xff]  ;;  %132 = vmatpush.msra.mxu0 %v82_v46  ;;  %152 = vmatpush.msra.mxu1 %v83_v47  ;;  %v253_v22 = vld [vmem:[#allocation4 + $0x2e8] sm:$0xff]  ;;  %v190_v47 = vld [vmem:[#allocation4 + $0xf0] sm:$0xff] }
  0x2d   :  { %v79_v52 = vld [vmem:[%s879_s0] sm:$0xff]  ;;  %327 = vmatpush.msra.mxu3 %v248_v49  ;;  %v185_v25 = vld [vmem:[#allocation4 + $0xc8] sm:$0xff] }
  0x2e   :  { %133 = vmatpush.msra.mxu0 %v80_v50  ;;  %153 = vmatpush.msra.mxu1 %v81_v51  ;;  %v180_v55 = vld [vmem:[#allocation4 + $0xa0] sm:$0xff]  ;;  %v249_v26 = vld [vmem:[#allocation4 + $0x2c8] sm:$0xff]  ;;  %v223_v51 = vld [vmem:[#allocation4 + $0x1f8] sm:$0xff] }
  0x2f   :  { %v244_v56 = vld [vmem:[#allocation4 + $0x2a0] sm:$0xff]  ;;  %134 = vmatmul.f32.vlgmr.msra.gmra.mxu0 %v79_v52  ;;  %154 = vmatmul.f32.vlgmr.msra.gmra.mxu1 %v79_v52  ;;  %v181_v29 = vld [vmem:[#allocation4 + $0xa8] sm:$0xff]  ;;  %v287_v52 = vld [vmem:[#allocation4 + $0x3f8] sm:$0xff] }
  0x30   :  { %338 = vmatpush.msrb.mxu0 %v221_v53  ;;  %358 = vmatpush.msrb.mxu1 %v285_v54  ;;  %v176_v59 = vld [vmem:[#allocation4 + $0x80] sm:$0xff]  ;;  %v245_v30 = vld [vmem:[#allocation4 + $0x2a8] sm:$0xff]  ;;  %v219_v53 = vld [vmem:[#allocation4 + $0x1d8] sm:$0xff] }
  0x31   :  { %v240_v60 = vld [vmem:[#allocation4 + $0x280] sm:$0xff]  ;;  %308 = vmatpush.msra.mxu2 %v180_v55  ;;  %328 = vmatpush.msra.mxu3 %v244_v56  ;;  %v177_v33 = vld [vmem:[#allocation4 + $0x88] sm:$0xff]  ;;  %v283_v54 = vld [vmem:[#allocation4 + $0x3d8] sm:$0xff] }
  0x32   :  { %339 = vmatpush.msrb.mxu0 %v217_v57  ;;  %359 = vmatpush.msrb.mxu1 %v281_v58  ;;  %v172_v63 = vld [vmem:[#allocation4 + $0x60] sm:$0xff]  ;;  %v241_v34 = vld [vmem:[#allocation4 + $0x288] sm:$0xff]  ;;  %v215_v55 = vld [vmem:[#allocation4 + $0x1b8] sm:$0xff] }
  0x33   :  { %v236_v0 = vld [vmem:[#allocation4 + $0x260] sm:$0xff]  ;;  %309 = vmatpush.msra.mxu2 %v176_v59  ;;  %329 = vmatpush.msra.mxu3 %v240_v60  ;;  %v173_v37 = vld [vmem:[#allocation4 + $0x68] sm:$0xff]  ;;  %v279_v56 = vld [vmem:[#allocation4 + $0x3b8] sm:$0xff] }
  0x34   :  { %v168_v3 = vld [vmem:[#allocation4 + $0x40] sm:$0xff]  ;;  %340 = vmatpush.msrb.mxu0 %v213_v61  ;;  %360 = vmatpush.msrb.mxu1 %v277_v62  ;;  %v237_v38 = vld [vmem:[#allocation4 + $0x268] sm:$0xff]  ;;  %v211_v57 = vld [vmem:[#allocation4 + $0x198] sm:$0xff] }
  0x35   :  { %v232_v4 = vld [vmem:[#allocation4 + $0x240] sm:$0xff]  ;;  %310 = vmatpush.msra.mxu2 %v172_v63  ;;  %330 = vmatpush.msra.mxu3 %v236_v0  ;;  %v169_v41 = vld [vmem:[#allocation4 + $0x48] sm:$0xff]  ;;  %v275_v58 = vld [vmem:[#allocation4 + $0x398] sm:$0xff] }
  0x36   :  { %341 = vmatpush.msrb.mxu0 %v209_v1  ;;  %361 = vmatpush.msrb.mxu1 %v273_v2  ;;  %v164_v7 = vld [vmem:[#allocation4 + $0x20] sm:$0xff]  ;;  %v233_v42 = vld [vmem:[#allocation4 + $0x248] sm:$0xff]  ;;  %v207_v59 = vld [vmem:[#allocation4 + $0x178] sm:$0xff] }
  0x37   :  { %v228_v8 = vld [vmem:[#allocation4 + $0x220] sm:$0xff]  ;;  %311 = vmatpush.msra.mxu2 %v168_v3  ;;  %331 = vmatpush.msra.mxu3 %v232_v4  ;;  %v165_v45 = vld [vmem:[#allocation4 + $0x28] sm:$0xff]  ;;  %v271_v60 = vld [vmem:[#allocation4 + $0x378] sm:$0xff] }
  0x38   :  { %342 = vmatpush.msrb.mxu0 %v205_v5  ;;  %362 = vmatpush.msrb.mxu1 %v269_v6  ;;  %v160_v11 = vld [vmem:[#allocation4] sm:$0xff]  ;;  %v229_v46 = vld [vmem:[#allocation4 + $0x228] sm:$0xff]  ;;  %v203_v61 = vld [vmem:[#allocation4 + $0x158] sm:$0xff] }
  0x39   :  { %v224_v12 = vld [vmem:[#allocation4 + $0x200] sm:$0xff]  ;;  %312 = vmatpush.msra.mxu2 %v164_v7  ;;  %332 = vmatpush.msra.mxu3 %v228_v8  ;;  %v161_v49 = vld [vmem:[#allocation4 + $0x8] sm:$0xff]  ;;  %v267_v62 = vld [vmem:[#allocation4 + $0x358] sm:$0xff] }
  0x3a   :  { %343 = vmatpush.msrb.mxu0 %v201_v9  ;;  %363 = vmatpush.msrb.mxu1 %v265_v10  ;;  %v225_v50 = vld [vmem:[#allocation4 + $0x208] sm:$0xff]  ;;  %v199_v63 = vld [vmem:[#allocation4 + $0x138] sm:$0xff]  ;;  %v186_v5 = vld [vmem:[#allocation4 + $0xd0] sm:$0xff] }
  0x3b   :  { %313 = vmatpush.msra.mxu2 %v160_v11  ;;  %333 = vmatpush.msra.mxu3 %v224_v12  ;;  %v263_v0 = vld [vmem:[#allocation4 + $0x338] sm:$0xff]  ;;  %v250_v6 = vld [vmem:[#allocation4 + $0x2d0] sm:$0xff] }
  0x3c   :  { %344 = vmatpush.msrb.mxu0 %v197_v13  ;;  %364 = vmatpush.msrb.mxu1 %v261_v14  ;;  %v195_v1 = vld [vmem:[#allocation4 + $0x118] sm:$0xff]  ;;  %v182_v9 = vld [vmem:[#allocation4 + $0xb0] sm:$0xff] }
  0x3d   :  { %378 = vmatpush.msrb.mxu2 %v222_v15  ;;  %398 = vmatpush.msrb.mxu3 %v286_v16  ;;  %v259_v2 = vld [vmem:[#allocation4 + $0x318] sm:$0xff]  ;;  %v246_v10 = vld [vmem:[#allocation4 + $0x2b0] sm:$0xff] }
  0x3e   :  { %345 = vmatpush.msrb.mxu0 %v193_v17  ;;  %365 = vmatpush.msrb.mxu1 %v257_v18  ;;  %v191_v3 = vld [vmem:[#allocation4 + $0xf8] sm:$0xff]  ;;  %v178_v13 = vld [vmem:[#allocation4 + $0x90] sm:$0xff] }
  0x3f   :  { %379 = vmatpush.msrb.mxu2 %v218_v19  ;;  %399 = vmatpush.msrb.mxu3 %v282_v20  ;;  %v255_v4 = vld [vmem:[#allocation4 + $0x2f8] sm:$0xff]  ;;  %v242_v14 = vld [vmem:[#allocation4 + $0x290] sm:$0xff] }
  0x40   :  { %346 = vmatpush.msrb.mxu0 %v189_v21  ;;  %366 = vmatpush.msrb.mxu1 %v253_v22  ;;  %v187_v7 = vld [vmem:[#allocation4 + $0xd8] sm:$0xff]  ;;  %v174_v17 = vld [vmem:[#allocation4 + $0x70] sm:$0xff] }
  0x41   :  { %380 = vmatpush.msrb.mxu2 %v214_v23  ;;  %400 = vmatpush.msrb.mxu3 %v278_v24  ;;  %v251_v8 = vld [vmem:[#allocation4 + $0x2d8] sm:$0xff]  ;;  %v238_v18 = vld [vmem:[#allocation4 + $0x270] sm:$0xff] }
  0x42   :  { %347 = vmatpush.msrb.mxu0 %v185_v25  ;;  %367 = vmatpush.msrb.mxu1 %v249_v26  ;;  %v183_v11 = vld [vmem:[#allocation4 + $0xb8] sm:$0xff]  ;;  %v170_v21 = vld [vmem:[#allocation4 + $0x50] sm:$0xff] }
  0x43   :  { %381 = vmatpush.msrb.mxu2 %v210_v27  ;;  %401 = vmatpush.msrb.mxu3 %v274_v28  ;;  %v247_v12 = vld [vmem:[#allocation4 + $0x2b8] sm:$0xff]  ;;  %v234_v22 = vld [vmem:[#allocation4 + $0x250] sm:$0xff] }
  0x44   :  { %348 = vmatpush.msrb.mxu0 %v181_v29  ;;  %368 = vmatpush.msrb.mxu1 %v245_v30  ;;  %v179_v15 = vld [vmem:[#allocation4 + $0x98] sm:$0xff]  ;;  %v166_v25 = vld [vmem:[#allocation4 + $0x30] sm:$0xff] }
  0x45   :  { %382 = vmatpush.msrb.mxu2 %v206_v31  ;;  %402 = vmatpush.msrb.mxu3 %v270_v32  ;;  %v243_v16 = vld [vmem:[#allocation4 + $0x298] sm:$0xff]  ;;  %v230_v26 = vld [vmem:[#allocation4 + $0x230] sm:$0xff] }
  0x46   :  { %349 = vmatpush.msrb.mxu0 %v177_v33  ;;  %369 = vmatpush.msrb.mxu1 %v241_v34  ;;  %v175_v19 = vld [vmem:[#allocation4 + $0x78] sm:$0xff]  ;;  %v162_v29 = vld [vmem:[#allocation4 + $0x10] sm:$0xff]  ;;  %v112_v33 = vld [vmem:[%s881_s2] sm:$0x3] }
  0x47   :  { %383 = vmatpush.msrb.mxu2 %v202_v35  ;;  %403 = vmatpush.msrb.mxu3 %v266_v36  ;;  %v239_v20 = vld [vmem:[#allocation4 + $0x278] sm:$0xff]  ;;  %v226_v30 = vld [vmem:[#allocation4 + $0x210] sm:$0xff]  ;;  %v114_v34 = vperm.slane %v112_v33, 0  ;;  %v115_v35 = vperm.slane %v112_v33, 1 }
  0x48   :  { %350 = vmatpush.msrb.mxu0 %v173_v37  ;;  %370 = vmatpush.msrb.mxu1 %v237_v38  ;;  %v171_v23 = vld [vmem:[#allocation4 + $0x58] sm:$0xff]  ;;  %v512_v33 = vld [vmem:[#allocation6 + $0x190] sm:$0xff] }
  0x49   :  { %384 = vmatpush.msrb.mxu2 %v198_v39  ;;  %404 = vmatpush.msrb.mxu3 %v262_v40  ;;  %v235_v24 = vld [vmem:[#allocation4 + $0x258] sm:$0xff] }
  0x4a   :  { %351 = vmatpush.msrb.mxu0 %v169_v41  ;;  %371 = vmatpush.msrb.mxu1 %v233_v42  ;;  %v167_v27 = vld [vmem:[#allocation4 + $0x38] sm:$0xff] }
  0x4b   :  { %385 = vmatpush.msrb.mxu2 %v194_v43  ;;  %405 = vmatpush.msrb.mxu3 %v258_v44  ;;  %v231_v28 = vld [vmem:[#allocation4 + $0x238] sm:$0xff] }
  0x4c   :  { %352 = vmatpush.msrb.mxu0 %v165_v45  ;;  %372 = vmatpush.msrb.mxu1 %v229_v46  ;;  %v163_v31 = vld [vmem:[#allocation4 + $0x18] sm:$0xff]  ;;  %v492_v46 = vld [vmem:[#allocation6 + $0xf0] sm:$0xff] }
  0x4d   :  { %386 = vmatpush.msrb.mxu2 %v190_v47  ;;  %406 = vmatpush.msrb.mxu3 %v254_v48  ;;  %v227_v32 = vld [vmem:[#allocation4 + $0x218] sm:$0xff]  ;;  %v476_v47 = vld [vmem:[#allocation6 + $0x70] sm:$0xff] }
  0x4e   :  { %353 = vmatpush.msrb.mxu0 %v161_v49  ;;  %373 = vmatpush.msrb.mxu1 %v225_v50  ;;  %v493_v42 = vld [vmem:[#allocation6 + $0xf8] sm:$0xff]  ;;  %v524_v48 = vld [vmem:[#allocation6 + $0x1f0] sm:$0xff]  ;;  %v491_v50 = vld [vmem:[#allocation6 + $0xe8] sm:$0xff] }
  0x4f   :  { %387 = vmatpush.msrb.mxu2 %v186_v5  ;;  %407 = vmatpush.msrb.mxu3 %v250_v6  ;;  %v477_v43 = vld [vmem:[#allocation6 + $0x78] sm:$0xff]  ;;  %v508_v49 = vld [vmem:[#allocation6 + $0x170] sm:$0xff]  ;;  %v470_v5 = vld [vmem:[#allocation6 + $0x40] sm:$0xff] }
  0x50   :  { %418 = vmatpush.msra.mxu0 %v223_v51  ;;  %438 = vmatpush.msra.mxu1 %v287_v52  ;;  %v525_v44 = vld [vmem:[#allocation6 + $0x1f8] sm:$0xff]  ;;  %v475_v51 = vld [vmem:[#allocation6 + $0x68] sm:$0xff]  ;;  %v518_v6 = vld [vmem:[#allocation6 + $0x1c0] sm:$0xff] }
  0x51   :  { %388 = vmatpush.msrb.mxu2 %v182_v9  ;;  %408 = vmatpush.msrb.mxu3 %v246_v10  ;;  %v509_v45 = vld [vmem:[#allocation6 + $0x178] sm:$0xff]  ;;  %v523_v52 = vld [vmem:[#allocation6 + $0x1e8] sm:$0xff]  ;;  %v484_v9 = vld [vmem:[#allocation6 + $0xb0] sm:$0xff] }
  0x52   :  { %419 = vmatpush.msra.mxu0 %v219_v53  ;;  %439 = vmatpush.msra.mxu1 %v283_v54  ;;  %v507_v53 = vld [vmem:[#allocation6 + $0x168] sm:$0xff]  ;;  %v490_v54 = vld [vmem:[#allocation6 + $0xe0] sm:$0xff] }
  0x53   :  { %389 = vmatpush.msrb.mxu2 %v178_v13  ;;  %409 = vmatpush.msrb.mxu3 %v242_v14  ;;  %v483_v10 = vld [vmem:[#allocation6 + $0xa8] sm:$0xff]  ;;  %v481_v13 = vld [vmem:[#allocation6 + $0x98] sm:$0xff]  ;;  %v504_v14 = vld [vmem:[#allocation6 + $0x150] sm:$0xff] }
  0x54   :  { %420 = vmatpush.msra.mxu0 %v215_v55  ;;  %440 = vmatpush.msra.mxu1 %v279_v56  ;;  %v474_v55 = vld [vmem:[#allocation6 + $0x60] sm:$0xff] }
  0x55   :  { %390 = vmatpush.msrb.mxu2 %v174_v17  ;;  %410 = vmatpush.msrb.mxu3 %v238_v18  ;;  %v522_v56 = vld [vmem:[#allocation6 + $0x1e0] sm:$0xff]  ;;  %v480_v17 = vld [vmem:[#allocation6 + $0x90] sm:$0xff]  ;;  %v503_v18 = vld [vmem:[#allocation6 + $0x148] sm:$0xff] }
  0x56   :  { %421 = vmatpush.msra.mxu0 %v211_v57  ;;  %441 = vmatpush.msra.mxu1 %v275_v58  ;;  %v506_v57 = vld [vmem:[#allocation6 + $0x160] sm:$0xff]  ;;  %v489_v58 = vld [vmem:[#allocation6 + $0xd8] sm:$0xff] }
  0x57   :  { %391 = vmatpush.msrb.mxu2 %v170_v21  ;;  %411 = vmatpush.msrb.mxu3 %v234_v22  ;;  %v479_v21 = vld [vmem:[#allocation6 + $0x88] sm:$0xff]  ;;  %v502_v22 = vld [vmem:[#allocation6 + $0x140] sm:$0xff] }
  0x58   :  { %422 = vmatpush.msra.mxu0 %v207_v59  ;;  %442 = vmatpush.msra.mxu1 %v271_v60  ;;  %v473_v59 = vld [vmem:[#allocation6 + $0x58] sm:$0xff] }
  0x59   :  { %392 = vmatpush.msrb.mxu2 %v166_v25  ;;  %412 = vmatpush.msrb.mxu3 %v230_v26  ;;  %v521_v60 = vld [vmem:[#allocation6 + $0x1d8] sm:$0xff]  ;;  %v478_v25 = vld [vmem:[#allocation6 + $0x80] sm:$0xff] }
  0x5a   :  { %423 = vmatpush.msra.mxu0 %v203_v61  ;;  %443 = vmatpush.msra.mxu1 %v267_v62  ;;  %v505_v61 = vld [vmem:[#allocation6 + $0x158] sm:$0xff]  ;;  %v488_v62 = vld [vmem:[#allocation6 + $0xd0] sm:$0xff] }
  0x5b   :  { %393 = vmatpush.msrb.mxu2 %v162_v29  ;;  %413 = vmatpush.msrb.mxu3 %v226_v30  ;;  %v501_v26 = vld [vmem:[#allocation6 + $0x138] sm:$0xff]  ;;  %v500_v29 = vld [vmem:[#allocation6 + $0x130] sm:$0xff] }
  0x5c   :  { %424 = vmatpush.msra.mxu0 %v199_v63  ;;  %444 = vmatpush.msra.mxu1 %v263_v0  ;;  %v472_v63 = vld [vmem:[#allocation6 + $0x50] sm:$0xff]  ;;  %v513_v30 = vld [vmem:[#allocation6 + $0x198] sm:$0xff] }
  0x5d   :  { %v520_v0 = vld [vmem:[#allocation6 + $0x1d0] sm:$0xff] }
  0x5e   :  { %425 = vmatpush.msra.mxu0 %v195_v1  ;;  %445 = vmatpush.msra.mxu1 %v259_v2  ;;  %v487_v1 = vld [vmem:[#allocation6 + $0xc8] sm:$0xff] }
  0x5f   :  { %v471_v2 = vld [vmem:[#allocation6 + $0x48] sm:$0xff] }
  0x60   :  { %426 = vmatpush.msra.mxu0 %v191_v3  ;;  %446 = vmatpush.msra.mxu1 %v255_v4  ;;  %v519_v3 = vld [vmem:[#allocation6 + $0x1c8] sm:$0xff]  ;;  %v486_v4 = vld [vmem:[#allocation6 + $0xc0] sm:$0xff] }
  0x62   :  { %427 = vmatpush.msra.mxu0 %v187_v7  ;;  %447 = vmatpush.msra.mxu1 %v251_v8  ;;  %v485_v7 = vld [vmem:[#allocation6 + $0xb8] sm:$0xff] }
  0x63   :  { %v469_v8 = vld [vmem:[#allocation6 + $0x38] sm:$0xff] }
  0x64   :  { %428 = vmatpush.msra.mxu0 %v183_v11  ;;  %448 = vmatpush.msra.mxu1 %v247_v12  ;;  %v482_v11 = vld [vmem:[#allocation6 + $0xa0] sm:$0xff]  ;;  %v468_v12 = vld [vmem:[#allocation6 + $0x30] sm:$0xff] }
  0x66   :  { %429 = vmatpush.msra.mxu0 %v179_v15  ;;  %449 = vmatpush.msra.mxu1 %v243_v16  ;;  %v517_v15 = vld [vmem:[#allocation6 + $0x1b8] sm:$0xff]  ;;  %v467_v16 = vld [vmem:[#allocation6 + $0x28] sm:$0xff] }
  0x68   :  { %430 = vmatpush.msra.mxu0 %v175_v19  ;;  %450 = vmatpush.msra.mxu1 %v239_v20  ;;  %v516_v19 = vld [vmem:[#allocation6 + $0x1b0] sm:$0xff]  ;;  %v466_v20 = vld [vmem:[#allocation6 + $0x20] sm:$0xff] }
  0x6a   :  { %431 = vmatpush.msra.mxu0 %v171_v23  ;;  %451 = vmatpush.msra.mxu1 %v235_v24  ;;  %v515_v23 = vld [vmem:[#allocation6 + $0x1a8] sm:$0xff]  ;;  %v465_v24 = vld [vmem:[#allocation6 + $0x18] sm:$0xff] }
  0x6c   :  { %432 = vmatpush.msra.mxu0 %v167_v27  ;;  %452 = vmatpush.msra.mxu1 %v231_v28  ;;  %v514_v27 = vld [vmem:[#allocation6 + $0x1a0] sm:$0xff]  ;;  %v464_v28 = vld [vmem:[#allocation6 + $0x10] sm:$0xff] }
  0x6e   :  { %433 = vmatpush.msra.mxu0 %v163_v31  ;;  %453 = vmatpush.msra.mxu1 %v227_v32  ;;  %v463_v31 = vld [vmem:[#allocation6 + $0x8] sm:$0xff] }
  0x6f   :  { %v499_v32 = vld [vmem:[#allocation6 + $0x128] sm:$0xff] }
  0xac   :  { %v135_v36 = vpop.f32.mrf.mxu0  ;;  %v155_v37 = vpop.f32.mrf.mxu1 }
  0xad   :  { %v136_v38 = vadd.f32 %v135_v36, %v114_v34  ;;  %v156_v39 = vadd.f32 %v155_v37, %v115_v35  ;;  %v462_v34 = vld [vmem:[#allocation6] sm:$0xff]  ;;  %v511_v36 = vld [vmem:[#allocation6 + $0x188] sm:$0xff]  ;;  %v497_v37 = vld [vmem:[#allocation6 + $0x118] sm:$0xff] }
  0xae   :  { %v498_v35 = vld [vmem:[#allocation6 + $0x120] sm:$0xff] }
  0xaf   :  { %v158_v40 = vmax.f32 %v136_v38, 0.0  ;;  %v159_v41 = vmax.f32 %v156_v39, 0.0  ;;  %v510_v38 = vld [vmem:[#allocation6 + $0x180] sm:$0xff]  ;;  %v496_v39 = vld [vmem:[#allocation6 + $0x110] sm:$0xff] }
  0xb1   :  { %314 = vmatmul.f32.vlgmr.msra.gmra.mxu2 %v158_v40  ;;  %334 = vmatmul.f32.vlgmr.msra.gmra.mxu3 %v159_v41 }
  0xb2   :  { %354 = vmatmul.f32.vlgmr.msrb.gmra.mxu0 %v158_v40  ;;  %374 = vmatmul.f32.vlgmr.msrb.gmra.mxu1 %v159_v41 }
  0xb3   :  { %550 = vmatpush.msra.mxu3 %v493_v42  ;;  %530 = vmatpush.msra.mxu2 %v477_v43  ;;  %v626_v42 = vld [vmem:[%s886_s7 + $0x78] sm:$0xff]  ;;  %v625_v43 = vld [vmem:[%s886_s7 + $0x70] sm:$0xff] }
  0xb4   :  { %590 = vmatpush.msrb.mxu1 %v525_v44  ;;  %570 = vmatpush.msrb.mxu0 %v509_v45  ;;  %v624_v44 = vld [vmem:[%s886_s7 + $0x68] sm:$0xff]  ;;  %v623_v45 = vld [vmem:[%s886_s7 + $0x60] sm:$0xff] }
  0xb5   :  { %551 = vmatpush.msra.mxu3 %v492_v46  ;;  %531 = vmatpush.msra.mxu2 %v476_v47  ;;  %v288_v46 = vld [vmem:[%s883_s4] sm:$0xf]  ;;  %v622_v47 = vld [vmem:[%s886_s7 + $0x58] sm:$0xff] }
  0xb6   :  { %591 = vmatpush.msrb.mxu1 %v524_v48  ;;  %571 = vmatpush.msrb.mxu0 %v508_v49  ;;  %v621_v48 = vld [vmem:[%s886_s7 + $0x50] sm:$0xff]  ;;  %v291_v49 = vperm.slane %v288_v46, 1 }
  0xb7   :  { %552 = vmatpush.msra.mxu3 %v491_v50  ;;  %532 = vmatpush.msra.mxu2 %v475_v51  ;;  %v620_v50 = vld [vmem:[%s886_s7 + $0x48] sm:$0xff] }
  0xb8   :  { %592 = vmatpush.msrb.mxu1 %v523_v52  ;;  %572 = vmatpush.msrb.mxu0 %v507_v53 }
  0xb9   :  { %394 = vmatmul.f32.vlgmr.msrb.gmra.mxu2 %v158_v40  ;;  %414 = vmatmul.f32.vlgmr.msrb.gmra.mxu3 %v159_v41 }
  0xba   :  { %434 = vmatmul.f32.vlgmr.msra.gmra.mxu0 %v158_v40  ;;  %454 = vmatmul.f32.vlgmr.msra.gmra.mxu1 %v159_v41  ;;  %v495_v40 = vld [vmem:[#allocation6 + $0x108] sm:$0xff]  ;;  %v494_v41 = vld [vmem:[#allocation6 + $0x100] sm:$0xff] }
  0xbb   :  { %553 = vmatpush.msra.mxu3 %v490_v54  ;;  %533 = vmatpush.msra.mxu2 %v474_v55  ;;  %v290_v54 = vperm.slane %v288_v46, 0 }
  0xbc   :  { %593 = vmatpush.msrb.mxu1 %v522_v56  ;;  %573 = vmatpush.msrb.mxu0 %v506_v57 }
  0xbd   :  { %554 = vmatpush.msra.mxu3 %v489_v58  ;;  %534 = vmatpush.msra.mxu2 %v473_v59  ;;  %v293_v59 = vperm.slane %v288_v46, 3 }
  0xbe   :  { %594 = vmatpush.msrb.mxu1 %v521_v60  ;;  %574 = vmatpush.msrb.mxu0 %v505_v61 }
  0xbf   :  { %555 = vmatpush.msra.mxu3 %v488_v62  ;;  %535 = vmatpush.msra.mxu2 %v472_v63 }
  0xc0   :  { %595 = vmatpush.msrb.mxu1 %v520_v0  ;;  %575 = vmatpush.msrb.mxu0 %v504_v14  ;;  %v615_v14 = vld [vmem:[%s886_s7 + $0x20] sm:$0xff] }
  0xc1   :  { %556 = vmatpush.msra.mxu3 %v487_v1  ;;  %536 = vmatpush.msra.mxu2 %v471_v2  ;;  %v292_v2 = vperm.slane %v288_v46, 2 }
  0xc2   :  { %596 = vmatpush.msrb.mxu1 %v519_v3  ;;  %576 = vmatpush.msrb.mxu0 %v503_v18  ;;  %v611_v18 = vld [vmem:[%s886_s7] sm:$0xff] }
  0xc3   :  { %557 = vmatpush.msra.mxu3 %v486_v4  ;;  %537 = vmatpush.msra.mxu2 %v470_v5 }
  0xc4   :  { %597 = vmatpush.msrb.mxu1 %v518_v6  ;;  %577 = vmatpush.msrb.mxu0 %v502_v22 }
  0xc5   :  { %558 = vmatpush.msra.mxu3 %v485_v7  ;;  %538 = vmatpush.msra.mxu2 %v469_v8 }
  0xc6   :  { %598 = vmatpush.msrb.mxu1 %v517_v15  ;;  %578 = vmatpush.msrb.mxu0 %v501_v26  ;;  %v614_v15 = vld [vmem:[%s886_s7 + $0x18] sm:$0xff] }
  0xc7   :  { %559 = vmatpush.msra.mxu3 %v484_v9  ;;  %539 = vmatpush.msra.mxu2 %v468_v12  ;;  %v617_v12 = vld [vmem:[%s886_s7 + $0x30] sm:$0xff] }
  0xc8   :  { %599 = vmatpush.msrb.mxu1 %v516_v19  ;;  %579 = vmatpush.msrb.mxu0 %v500_v29  ;;  %v667_v19 = vld [vmem:[%s885_s6] ss:$0 sm:$0xff] }
  0xc9   :  { %560 = vmatpush.msra.mxu3 %v483_v10  ;;  %540 = vmatpush.msra.mxu2 %v467_v16  ;;  %v619_v10 = vld [vmem:[%s886_s7 + $0x40] sm:$0xff]  ;;  %v613_v16 = vld [vmem:[%s886_s7 + $0x10] sm:$0xff] }
  0xca   :  { %600 = vmatpush.msrb.mxu1 %v515_v23  ;;  %580 = vmatpush.msrb.mxu0 %v499_v32  ;;  %v668_v29 = vld [vmem:[%s887_s8] ss:$0 sm:$0xff] }
  0xcb   :  { %561 = vmatpush.msra.mxu3 %v482_v11  ;;  %541 = vmatpush.msra.mxu2 %v466_v20  ;;  %v618_v11 = vld [vmem:[%s886_s7 + $0x38] sm:$0xff] }
  0xcc   :  { %601 = vmatpush.msrb.mxu1 %v514_v27  ;;  %581 = vmatpush.msrb.mxu0 %v498_v35 }
  0xcd   :  { %562 = vmatpush.msra.mxu3 %v481_v13  ;;  %542 = vmatpush.msra.mxu2 %v465_v24  ;;  %v616_v13 = vld [vmem:[%s886_s7 + $0x28] sm:$0xff] }
  0xce   :  { %602 = vmatpush.msrb.mxu1 %v513_v30  ;;  %582 = vmatpush.msrb.mxu0 %v497_v37 }
  0xcf   :  { %563 = vmatpush.msra.mxu3 %v480_v17  ;;  %543 = vmatpush.msra.mxu2 %v464_v28  ;;  %v612_v17 = vld [vmem:[%s886_s7 + $0x8] sm:$0xff] }
  0xd0   :  { %603 = vmatpush.msrb.mxu1 %v512_v33  ;;  %583 = vmatpush.msrb.mxu0 %v496_v39 }
  0xd1   :  { %564 = vmatpush.msra.mxu3 %v479_v21  ;;  %544 = vmatpush.msra.mxu2 %v463_v31 }
  0xd2   :  { %604 = vmatpush.msrb.mxu1 %v511_v36  ;;  %584 = vmatpush.msrb.mxu0 %v495_v40 }
  0xd3   :  { %565 = vmatpush.msra.mxu3 %v478_v25  ;;  %545 = vmatpush.msra.mxu2 %v462_v34 }
  0xd4   :  { %605 = vmatpush.msrb.mxu1 %v510_v38  ;;  %585 = vmatpush.msrb.mxu0 %v494_v41 }
  0xd5   :  { %631 = vmatpush.msrb.mxu2 %v626_v42 }
  0xd7   :  { %632 = vmatpush.msrb.mxu2 %v625_v43 }
  0xd9   :  { %633 = vmatpush.msrb.mxu2 %v624_v44 }
  0xdb   :  { %634 = vmatpush.msrb.mxu2 %v623_v45 }
  0xdd   :  { %635 = vmatpush.msrb.mxu2 %v622_v47 }
  0xdf   :  { %636 = vmatpush.msrb.mxu2 %v621_v48 }
  0xe1   :  { %637 = vmatpush.msrb.mxu2 %v620_v50 }
  0xe3   :  { %638 = vmatpush.msrb.mxu2 %v619_v10 }
  0xe5   :  { %639 = vmatpush.msrb.mxu2 %v618_v11 }
  0xe7   :  { %640 = vmatpush.msrb.mxu2 %v617_v12 }
  0xe9   :  { %641 = vmatpush.msrb.mxu2 %v616_v13 }
  0xeb   :  { %642 = vmatpush.msrb.mxu2 %v615_v14 }
  0xed   :  { %643 = vmatpush.msrb.mxu2 %v614_v15 }
  0xef   :  { %644 = vmatpush.msrb.mxu2 %v613_v16 }
  0xf1   :  { %645 = vmatpush.msrb.mxu2 %v612_v17 }
  0xf3   :  { %646 = vmatpush.msrb.mxu2 %v611_v18 }
 0x12f   :  { %v355_v51 = vpop.f32.mrf.mxu0  ;;  %v375_v52 = vpop.f32.mrf.mxu1 }
 0x130   :  { %v356_v53 = vadd.f32 %v355_v51, %v291_v49 }
 0x132   :  { %v376_v55 = vadd.f32 %v375_v52, %v356_v53 }
 0x134   :  { %v459_v56 = vmax.f32 %v376_v55, 0.0  ;;  %v315_v57 = vpop.f32.mrf.mxu2  ;;  %v335_v58 = vpop.f32.mrf.mxu3 }
 0x135   :  { %v316_v60 = vadd.f32 %v315_v57, %v290_v54 }
 0x136   :  { %566 = vmatmul.f32.vlgmr.msra.gmra.mxu3 %v459_v56 }
 0x137   :  { %v336_v61 = vadd.f32 %v335_v58, %v316_v60  ;;  %v435_v62 = vpop.f32.mrf.mxu0  ;;  %v455_v1 = vpop.f32.mrf.mxu1 }
 0x138   :  { %v436_v63 = vadd.f32 %v435_v62, %v293_v59 }
 0x139   :  { %v458_v0 = vmax.f32 %v336_v61, 0.0 }
 0x13a   :  { %v456_v3 = vadd.f32 %v455_v1, %v436_v63 }
 0x13b   :  { %546 = vmatmul.f32.vlgmr.msra.gmra.mxu2 %v458_v0 }
 0x13c   :  { %v461_v4 = vmax.f32 %v456_v3, 0.0  ;;  %v395_v5 = vpop.f32.mrf.mxu2  ;;  %v415_v7 = vpop.f32.mrf.mxu3 }
 0x13d   :  { %v396_v6 = vadd.f32 %v395_v5, %v292_v2 }
 0x13e   :  { %606 = vmatmul.f32.vlgmr.msrb.gmra.mxu1 %v461_v4 }
 0x13f   :  { %v416_v8 = vadd.f32 %v415_v7, %v396_v6 }
 0x141   :  { %v460_v9 = vmax.f32 %v416_v8, 0.0 }
 0x143   :  { %586 = vmatmul.f32.vlgmr.msrb.gmra.mxu0 %v460_v9 }
 0x1b9   :  { %v567_v22 = vpop.f32.mrf.mxu3 }
 0x1bb   :  { %v607_v26 = vpop.f32.mrf.mxu1 }
 0x1be   :  { %v547_v20 = vpop.f32.mrf.mxu2 }
 0x1bf   :  { %v548_v21 = vadd.f32 %v667_v19, %v547_v20 }
 0x1c0   :  { %v587_v24 = vpop.f32.mrf.mxu0 }
 0x1c1   :  { %v568_v23 = vadd.f32 %v567_v22, %v548_v21 }
 0x1c3   :  { %v588_v25 = vadd.f32 %v587_v24, %v568_v23 }
 0x1c5   :  { %v608_v27 = vadd.f32 %v607_v26, %v588_v25 }
 0x1c7   :  { %v610_v28 = vmax.f32 %v608_v27, 0.0 }
 0x1c9   :  { %647 = vmatmul.f32.vlgmr.msrb.gmra.mxu2 %v610_v28 }
 0x24c   :  { %v648_v30 = vpop.f32.mrf.mxu2 }
 0x24d   :  { %v649_v31 = vadd.f32 %v668_v29, %v648_v30 }
 0x24f   :  { %651 = vst [vmem:[%s888_s9] sm:$0xff] %v649_v31 }
 0x250   :  { %656 = vsyncpa [#allocation3], 1 }
 0x251   :  { %657 = vsyncpa [#allocation5], 1 }

</bundles_post_ra>
